<compile_context>
chip_gen: v7x
topology: tpu7x:2x2x1
jax: 0.10.0
libtpu: 0.0.40
codegen_flags: <defaults>
</compile_context>

<pallas_src>
import functools

import jax
import jax.numpy as jnp
from jax.experimental import pallas as pl
from jax.experimental.pallas import tpu as pltpu

# ----------------------------- configuration --------------------------------
TEMPERATURE = 1.0          # Distillator default (T must be >= 1; inference always 1)
VOCAB = 32
HIDDEN = 32
SEQ = 8
BATCH = 2
NUM_LABELS = 4
TEACHER_LAYERS = 4         # student gets layers 0, 2, ... of the teacher


# ------------------------- single fused Pallas kernel ------------------------
def _fused_distill_kernel(meta_ref, w_ref, b_ref, out_ref, *,
                          temperature, batch, seq, vocab, hidden,
                          num_labels, teacher_layers):
    """Entire Distillator.forward (synthetic encoder) in one kernel body.

    meta_ref : (B*S, 3) int32  — columns [input_ids | attention_mask | labels(padded)]
    w_ref    : (H, 196) f32    — [emb | layer W x L | cls_dense W | cls_out W] lane-packed
    b_ref    : (L+2, H) f32    — rows 0..L-1 layer biases, row L cls_dense b, row L+1 cls_out b
    out_ref  : (B, C+1) f32    — [:, :C] = softmax(student_logits, 1); [:, C] = loss
    """
    f32 = jnp.float32
    B, S, H, V, C, L = batch, seq, hidden, vocab, num_labels, teacher_layers
    BS = B * S

    meta = meta_ref[...]                          # (BS, 3) int32
    ids = meta[:, 0:1]                            # (BS, 1)
    mask = meta[:, 1:2].astype(f32)               # (BS, 1)

    # ---- embedding gather as one-hot matmul (MXU), masked in the same pass -----
    emb = w_ref[:, 0:H]                           # (V, H)
    vocab_iota = jax.lax.broadcasted_iota(jnp.int32, (BS, V), 1)
    gather = (vocab_iota == ids).astype(f32)      # (BS, V) one-hot rows
    h = jnp.dot(gather, emb, preferred_element_type=f32) * mask     # (BS, H)

    def layer_w(l):
        return w_ref[:, H * (1 + l):H * (2 + l)]

    def layer_b(l):
        return b_ref[l:l + 1, :]

    def dense_tanh(x, w, b):
        return jnp.tanh(jnp.dot(x, w, preferred_element_type=f32) + b)

    # ---- encoders: layer 0 is shared between teacher and student (dedup) -------
    h1 = dense_tanh(h, layer_w(0), layer_b(0))
    h_t = h1                                      # teacher: layers 0 .. L-1
    for l in range(1, L):                         # static, fully unrolled (L tiny)
        h_t = dense_tanh(h_t, layer_w(l), layer_b(l))
    h_s = h1                                      # student: teacher layers 0, 2, ...
    for l in range(2, L, 2):
        h_s = dense_tanh(h_s, layer_w(l), layer_b(l))

    # ---- batched CLS pooling: one iota-selector matmul over [student ; teacher] -
    h_cat = jnp.concatenate([h_s, h_t], axis=0)                      # (2*BS, H)
    col = jax.lax.broadcasted_iota(jnp.int32, (2 * B, 2 * BS), 1)
    row = jax.lax.broadcasted_iota(jnp.int32, (2 * B, 2 * BS), 0)
    cls_tok = jnp.where(row < B, row * S, BS + (row - B) * S)
    sel = (col == cls_tok).astype(f32)                               # (2B, 2*BS)
    feat = jnp.dot(sel, h_cat, preferred_element_type=f32)           # (2B, H)

    # ---- batched classification head (same weights for both branches) ----------
    cls_dense_w = w_ref[:, H * (1 + L):H * (2 + L)]                  # (H, H)
    cls_out_w = w_ref[:, H * (2 + L):H * (2 + L) + C]                # (H, C)
    cls_dense_b = b_ref[L:L + 1, :]                                  # (1, H)
    cls_out_b = b_ref[L + 1:L + 2, 0:C]                              # (1, C)
    head_h = jnp.tanh(jnp.dot(feat, cls_dense_w, preferred_element_type=f32) + cls_dense_b)
    logits2 = jnp.dot(head_h, cls_out_w, preferred_element_type=f32) + cls_out_b   # (2B, C)
    s_logits = logits2[0:B, :]
    t_logits = logits2[B:2 * B, :]

    def softmax_exact(x):
        m = jnp.max(x, axis=1, keepdims=True)
        e = jnp.exp(x - m)
        return e / jnp.sum(e, axis=1, keepdims=True)

    # ---- Distillator.forward outputs --------------------------------------------
    probs = softmax_exact(s_logits)               # returned distribution (temperature 1)

    inv_t = f32(1.0 / temperature)
    s = softmax_exact(s_logits * inv_t)           # CE *input* is probabilities (per module)
    t = softmax_exact(t_logits * inv_t)           # soft target (teacher probabilities)

    # torch CrossEntropyLoss applies log_softmax to its input, i.e. to the already
    # softmaxed probabilities here (double softmax — faithful to the original module).
    m = jnp.max(s, axis=1, keepdims=True)
    lse = m + jnp.log(jnp.sum(jnp.exp(s - m), axis=1, keepdims=True))
    log_s = s - lse

    lab = meta[0:B, 2:3]                          # (B, 1) int32 labels
    cls_iota = jax.lax.broadcasted_iota(jnp.int32, (B, C), 1)
    y = (cls_iota == lab).astype(f32)             # one-hot labels built in-kernel

    nb = f32(B)
    ce_hard = -jnp.sum(y * log_s) / nb            # CrossEntropyLoss(s, labels)
    ce_soft = -jnp.sum(t * log_s) / nb            # CrossEntropyLoss(s, t) soft targets

    # CosineEmbeddingLoss(t, s, target=+1) = mean(1 - cos_sim(t, s)); exact divides.
    dots = jnp.sum(t * s, axis=1, keepdims=True)
    denom = jnp.sqrt(jnp.sum(t * t, axis=1, keepdims=True)
                     * jnp.sum(s * s, axis=1, keepdims=True))
    cos = dots / jnp.maximum(denom, 1e-8)
    cos_loss = jnp.sum(1.0 - cos) / nb

    loss = (ce_hard + ce_soft + cos_loss) / 3.0

    # Single merged output tile: probabilities + scalar loss in the spare lane.
    out_ref[:, 0:C] = probs.astype(out_ref.dtype)
    out_ref[:, C:C + 1] = jnp.broadcast_to(jnp.reshape(loss, (1, 1)), (B, 1)).astype(out_ref.dtype)


def pallas_distillator(meta, w_slab, b_slab, *, temperature=TEMPERATURE,
                       batch=BATCH, seq=SEQ, vocab=VOCAB, hidden=HIDDEN,
                       num_labels=NUM_LABELS, teacher_layers=TEACHER_LAYERS):
    kernel = functools.partial(
        _fused_distill_kernel, temperature=temperature, batch=batch, seq=seq,
        vocab=vocab, hidden=hidden, num_labels=num_labels,
        teacher_layers=teacher_layers)
    # No grid: single invocation, whole (tiny) arrays VMEM-resident, no pipeline
    # prologue/epilogue or double-buffering emitted.
    return pl.pallas_call(
        kernel,
        out_shape=jax.ShapeDtypeStruct((batch, num_labels + 1), jnp.float32),
        in_specs=[pl.BlockSpec(memory_space=pltpu.MemorySpace.VMEM)] * 3,
        out_specs=pl.BlockSpec(memory_space=pltpu.MemorySpace.VMEM),
    )(meta, w_slab, b_slab)


# --------------------------- model glue (plain JAX) ---------------------------
def init_params(key):
    """Deterministic synthetic teacher parameters, built directly in the packed
    kernel layout: one lane-dense weight slab and one bias slab."""
    keys = jax.random.split(key, 3 + 2 * TEACHER_LAYERS)
    emb = jax.random.normal(keys[0], (VOCAB, HIDDEN), jnp.float32) * 0.02
    cls_dense_w = jax.random.normal(keys[1], (HIDDEN, HIDDEN), jnp.float32) * 0.02
    cls_out_w = jax.random.normal(keys[2], (HIDDEN, NUM_LABELS), jnp.float32) * 0.02
    layers_w = [jax.random.normal(keys[3 + 2 * l], (HIDDEN, HIDDEN), jnp.float32) * 0.05
                for l in range(TEACHER_LAYERS)]
    layers_b = [jax.random.normal(keys[4 + 2 * l], (1, HIDDEN), jnp.float32) * 0.01
                for l in range(TEACHER_LAYERS)]
    # (H, 196) = [emb | W0..W3 | cls_dense_w | cls_out_w]
    w_slab = jnp.concatenate([emb] + layers_w + [cls_dense_w, cls_out_w], axis=1)
    # (L+2, H) = [b0..b3 ; cls_dense_b ; cls_out_b (padded to H lanes)]
    b_slab = jnp.concatenate(layers_b + [jnp.zeros((1, HIDDEN), jnp.float32),
                                         jnp.zeros((1, HIDDEN), jnp.float32)], axis=0)
    return {"w_slab": w_slab, "b_slab": b_slab}


@jax.jit
def distillator_forward(params, input_ids, attention_mask, labels):
    """Returns (softmax(student_logits, 1), distillation_loss), like Distillator.forward."""
    b, s = input_ids.shape
    bs = b * s
    lab_col = jnp.zeros((bs,), jnp.int32).at[:b].set(labels.astype(jnp.int32))
    meta = jnp.stack([input_ids.reshape(bs).astype(jnp.int32),
                      attention_mask.reshape(bs).astype(jnp.int32),
                      lab_col], axis=1)                              # (B*S, 3) int32
    out = pallas_distillator(meta, params["w_slab"], params["b_slab"])
    return out[:, :NUM_LABELS], out[0, NUM_LABELS]


# ----------------------------------- main -------------------------------------
if __name__ == "__main__":
    key = jax.random.PRNGKey(0)
    k_param, k_ids, k_mask, k_lab = jax.random.split(key, 4)

    params = init_params(k_param)
    input_ids = jax.random.randint(k_ids, (BATCH, SEQ), 0, VOCAB, dtype=jnp.int32)
    attention_mask = jnp.ones((BATCH, SEQ), jnp.int32).at[:, -2:].set(0)  # some padding
    labels = jax.random.randint(k_lab, (BATCH,), 0, NUM_LABELS, dtype=jnp.int32)

    probs, loss = distillator_forward(params, input_ids, attention_mask, labels)
    probs = jax.block_until_ready(probs)
    loss = jax.block_until_ready(loss)

    # sanity: probabilities sum to 1 and loss is finite
    assert probs.shape == (BATCH, NUM_LABELS)
    assert bool(jnp.all(jnp.isfinite(probs))) and bool(jnp.isfinite(loss))
    assert bool(jnp.allclose(jnp.sum(probs, axis=1), 1.0, atol=1e-4))

    print("KERNEL_OK")
</pallas_src>

<mosaic_0001>
module attributes {stable_mosaic.version = 11 : i64} {
  func.func @_fused_distill_kernel(%arg0: memref<16x3xi32, #tpu.memory_space<vmem>>, %arg1: memref<32x196xf32, #tpu.memory_space<vmem>>, %arg2: memref<6x32xf32, #tpu.memory_space<vmem>>, %arg3: memref<2x5xf32, #tpu.memory_space<vmem>>) attributes {dimension_semantics = [], scalar_prefetch = 0 : i64, scratch_operands = 0 : i64, tpu.core_type = #tpu.core_type<tc>} {
    %c0 = arith.constant 0 : index
    %c0_0 = arith.constant 0 : index
    %0 = vector.load %arg0[%c0, %c0_0] : memref<16x3xi32, #tpu.memory_space<vmem>>, vector<16x3xi32>
    %1 = vector.extract_strided_slice %0 {offsets = [0, 0], sizes = [16, 1], strides = [1, 1]} : vector<16x3xi32> to vector<16x1xi32>
    %2 = vector.extract_strided_slice %0 {offsets = [0, 1], sizes = [16, 1], strides = [1, 1]} : vector<16x3xi32> to vector<16x1xi32>
    %3 = arith.sitofp %2 : vector<16x1xi32> to vector<16x1xf32>
    %c0_1 = arith.constant 0 : index
    %c0_2 = arith.constant 0 : index
    %4 = vector.load %arg1[%c0_1, %c0_2] : memref<32x196xf32, #tpu.memory_space<vmem>>, vector<32x32xf32>
    %5 = tpu.iota {dimensions = array<i32: 1>} : vector<16x32xi32>
    %6 = vector.broadcast %1 : vector<16x1xi32> to vector<16x32xi32>
    %7 = arith.cmpi eq, %5, %6 : vector<16x32xi32>
    %8 = arith.extui %7 : vector<16x32xi1> to vector<16x32xi32>
    %9 = arith.sitofp %8 : vector<16x32xi32> to vector<16x32xf32>
    %cst = arith.constant dense<0.000000e+00> : vector<16x32xf32>
    %10 = tpu.matmul %9, %4, %cst {dimension_numbers = #tpu.dot_dimension_numbers<[1], [0], [0], [1], [0, 0, 1, 1], [], []>} : vector<16x32xf32>, vector<32x32xf32>, vector<16x32xf32> -> vector<16x32xf32>
    %11 = vector.broadcast %3 : vector<16x1xf32> to vector<16x32xf32>
    %12 = arith.mulf %10, %11 : vector<16x32xf32>
    %c0_3 = arith.constant 0 : index
    %c32 = arith.constant 32 : index
    %13 = vector.load %arg1[%c0_3, %c32] : memref<32x196xf32, #tpu.memory_space<vmem>>, vector<32x32xf32>
    %c0_4 = arith.constant 0 : index
    %c0_5 = arith.constant 0 : index
    %14 = vector.load %arg2[%c0_4, %c0_5] : memref<6x32xf32, #tpu.memory_space<vmem>>, vector<1x32xf32>
    %cst_6 = arith.constant dense<0.000000e+00> : vector<16x32xf32>
    %15 = tpu.matmul %12, %13, %cst_6 {dimension_numbers = #tpu.dot_dimension_numbers<[1], [0], [0], [1], [0, 0, 1, 1], [], []>} : vector<16x32xf32>, vector<32x32xf32>, vector<16x32xf32> -> vector<16x32xf32>
    %16 = vector.broadcast %14 : vector<1x32xf32> to vector<16x32xf32>
    %17 = arith.addf %15, %16 : vector<16x32xf32>
    %18 = math.tanh %17 : vector<16x32xf32>
    %c0_7 = arith.constant 0 : index
    %c64 = arith.constant 64 : index
    %19 = vector.load %arg1[%c0_7, %c64] : memref<32x196xf32, #tpu.memory_space<vmem>>, vector<32x32xf32>
    %c1 = arith.constant 1 : index
    %c0_8 = arith.constant 0 : index
    %20 = vector.load %arg2[%c1, %c0_8] : memref<6x32xf32, #tpu.memory_space<vmem>>, vector<1x32xf32>
    %cst_9 = arith.constant dense<0.000000e+00> : vector<16x32xf32>
    %21 = tpu.matmul %18, %19, %cst_9 {dimension_numbers = #tpu.dot_dimension_numbers<[1], [0], [0], [1], [0, 0, 1, 1], [], []>} : vector<16x32xf32>, vector<32x32xf32>, vector<16x32xf32> -> vector<16x32xf32>
    %22 = vector.broadcast %20 : vector<1x32xf32> to vector<16x32xf32>
    %23 = arith.addf %21, %22 : vector<16x32xf32>
    %24 = math.tanh %23 : vector<16x32xf32>
    %c0_10 = arith.constant 0 : index
    %c96 = arith.constant 96 : index
    %25 = vector.load %arg1[%c0_10, %c96] : memref<32x196xf32, #tpu.memory_space<vmem>>, vector<32x32xf32>
    %c2 = arith.constant 2 : index
    %c0_11 = arith.constant 0 : index
    %26 = vector.load %arg2[%c2, %c0_11] : memref<6x32xf32, #tpu.memory_space<vmem>>, vector<1x32xf32>
    %cst_12 = arith.constant dense<0.000000e+00> : vector<16x32xf32>
    %27 = tpu.matmul %24, %25, %cst_12 {dimension_numbers = #tpu.dot_dimension_numbers<[1], [0], [0], [1], [0, 0, 1, 1], [], []>} : vector<16x32xf32>, vector<32x32xf32>, vector<16x32xf32> -> vector<16x32xf32>
    %28 = vector.broadcast %26 : vector<1x32xf32> to vector<16x32xf32>
    %29 = arith.addf %27, %28 : vector<16x32xf32>
    %30 = math.tanh %29 : vector<16x32xf32>
    %c0_13 = arith.constant 0 : index
    %c128 = arith.constant 128 : index
    %31 = vector.load %arg1[%c0_13, %c128] : memref<32x196xf32, #tpu.memory_space<vmem>>, vector<32x32xf32>
    %c3 = arith.constant 3 : index
    %c0_14 = arith.constant 0 : index
    %32 = vector.load %arg2[%c3, %c0_14] : memref<6x32xf32, #tpu.memory_space<vmem>>, vector<1x32xf32>
    %cst_15 = arith.constant dense<0.000000e+00> : vector<16x32xf32>
    %33 = tpu.matmul %30, %31, %cst_15 {dimension_numbers = #tpu.dot_dimension_numbers<[1], [0], [0], [1], [0, 0, 1, 1], [], []>} : vector<16x32xf32>, vector<32x32xf32>, vector<16x32xf32> -> vector<16x32xf32>
    %34 = vector.broadcast %32 : vector<1x32xf32> to vector<16x32xf32>
    %35 = arith.addf %33, %34 : vector<16x32xf32>
    %36 = math.tanh %35 : vector<16x32xf32>
    %c0_16 = arith.constant 0 : index
    %c96_17 = arith.constant 96 : index
    %37 = vector.load %arg1[%c0_16, %c96_17] : memref<32x196xf32, #tpu.memory_space<vmem>>, vector<32x32xf32>
    %c2_18 = arith.constant 2 : index
    %c0_19 = arith.constant 0 : index
    %38 = vector.load %arg2[%c2_18, %c0_19] : memref<6x32xf32, #tpu.memory_space<vmem>>, vector<1x32xf32>
    %cst_20 = arith.constant dense<0.000000e+00> : vector<16x32xf32>
    %39 = tpu.matmul %18, %37, %cst_20 {dimension_numbers = #tpu.dot_dimension_numbers<[1], [0], [0], [1], [0, 0, 1, 1], [], []>} : vector<16x32xf32>, vector<32x32xf32>, vector<16x32xf32> -> vector<16x32xf32>
    %40 = vector.broadcast %38 : vector<1x32xf32> to vector<16x32xf32>
    %41 = arith.addf %39, %40 : vector<16x32xf32>
    %42 = math.tanh %41 : vector<16x32xf32>
    %43 = tpu.concatenate %42, %36 in 0 : vector<16x32xf32>, vector<16x32xf32> -> vector<32x32xf32>
    %44 = tpu.iota {dimensions = array<i32: 1>} : vector<4x32xi32>
    %45 = tpu.iota {dimensions = array<i32: 0>} : vector<4x32xi32>
    %c2_i32 = arith.constant 2 : i32
    %46 = vector.broadcast %c2_i32 : i32 to vector<4x32xi32>
    %47 = arith.cmpi slt, %45, %46 : vector<4x32xi32>
    %c8_i32 = arith.constant 8 : i32
    %48 = vector.broadcast %c8_i32 : i32 to vector<4x32xi32>
    %49 = arith.muli %45, %48 : vector<4x32xi32>
    %c2_i32_21 = arith.constant 2 : i32
    %50 = vector.broadcast %c2_i32_21 : i32 to vector<4x32xi32>
    %51 = arith.subi %45, %50 : vector<4x32xi32>
    %c8_i32_22 = arith.constant 8 : i32
    %52 = vector.broadcast %c8_i32_22 : i32 to vector<4x32xi32>
    %53 = arith.muli %51, %52 : vector<4x32xi32>
    %c16_i32 = arith.constant 16 : i32
    %54 = vector.broadcast %c16_i32 : i32 to vector<4x32xi32>
    %55 = arith.addi %54, %53 : vector<4x32xi32>
    %56 = arith.select %47, %49, %55 : vector<4x32xi1>, vector<4x32xi32>
    %57 = arith.cmpi eq, %44, %56 : vector<4x32xi32>
    %58 = arith.extui %57 : vector<4x32xi1> to vector<4x32xi32>
    %59 = arith.sitofp %58 : vector<4x32xi32> to vector<4x32xf32>
    %cst_23 = arith.constant dense<0.000000e+00> : vector<4x32xf32>
    %60 = tpu.matmul %59, %43, %cst_23 {dimension_numbers = #tpu.dot_dimension_numbers<[1], [0], [0], [1], [0, 0, 1, 1], [], []>} : vector<4x32xf32>, vector<32x32xf32>, vector<4x32xf32> -> vector<4x32xf32>
    %c0_24 = arith.constant 0 : index
    %c160 = arith.constant 160 : index
    %61 = vector.load %arg1[%c0_24, %c160] : memref<32x196xf32, #tpu.memory_space<vmem>>, vector<32x32xf32>
    %c0_25 = arith.constant 0 : index
    %c192 = arith.constant 192 : index
    %62 = vector.load %arg1[%c0_25, %c192] : memref<32x196xf32, #tpu.memory_space<vmem>>, vector<32x4xf32>
    %c4 = arith.constant 4 : index
    %c0_26 = arith.constant 0 : index
    %63 = vector.load %arg2[%c4, %c0_26] : memref<6x32xf32, #tpu.memory_space<vmem>>, vector<1x32xf32>
    %c5 = arith.constant 5 : index
    %c0_27 = arith.constant 0 : index
    %64 = vector.load %arg2[%c5, %c0_27] : memref<6x32xf32, #tpu.memory_space<vmem>>, vector<1x4xf32>
    %cst_28 = arith.constant dense<0.000000e+00> : vector<4x32xf32>
    %65 = tpu.matmul %60, %61, %cst_28 {dimension_numbers = #tpu.dot_dimension_numbers<[1], [0], [0], [1], [0, 0, 1, 1], [], []>} : vector<4x32xf32>, vector<32x32xf32>, vector<4x32xf32> -> vector<4x32xf32>
    %66 = vector.broadcast %63 : vector<1x32xf32> to vector<4x32xf32>
    %67 = arith.addf %65, %66 : vector<4x32xf32>
    %68 = math.tanh %67 : vector<4x32xf32>
    %cst_29 = arith.constant dense<0.000000e+00> : vector<4x4xf32>
    %69 = tpu.matmul %68, %62, %cst_29 {dimension_numbers = #tpu.dot_dimension_numbers<[1], [0], [0], [1], [0, 0, 1, 1], [], []>} : vector<4x32xf32>, vector<32x4xf32>, vector<4x4xf32> -> vector<4x4xf32>
    %70 = vector.broadcast %64 : vector<1x4xf32> to vector<4x4xf32>
    %71 = arith.addf %69, %70 : vector<4x4xf32>
    %72 = vector.extract_strided_slice %71 {offsets = [0, 0], sizes = [2, 4], strides = [1, 1]} : vector<4x4xf32> to vector<2x4xf32>
    %73 = vector.extract_strided_slice %71 {offsets = [2, 0], sizes = [2, 4], strides = [1, 1]} : vector<4x4xf32> to vector<2x4xf32>
    %cst_30 = arith.constant dense<0xFF800000> : vector<2xf32>
    %74 = vector.multi_reduction <maximumf>, %72, %cst_30 [1] : vector<2x4xf32> to vector<2xf32>
    %75 = vector.shape_cast %74 : vector<2xf32> to vector<2x1xf32>
    %76 = vector.broadcast %75 : vector<2x1xf32> to vector<2x4xf32>
    %77 = arith.subf %72, %76 : vector<2x4xf32>
    %78 = math.exp %77 : vector<2x4xf32>
    %cst_31 = arith.constant dense<0.000000e+00> : vector<2xf32>
    %79 = vector.multi_reduction <add>, %78, %cst_31 [1] : vector<2x4xf32> to vector<2xf32>
    %80 = vector.shape_cast %79 : vector<2xf32> to vector<2x1xf32>
    %81 = vector.broadcast %80 : vector<2x1xf32> to vector<2x4xf32>
    %82 = arith.divf %78, %81 : vector<2x4xf32>
    %cst_32 = arith.constant 1.000000e+00 : f32
    %83 = vector.broadcast %cst_32 : f32 to vector<2x4xf32>
    %84 = arith.mulf %72, %83 : vector<2x4xf32>
    %cst_33 = arith.constant dense<0xFF800000> : vector<2xf32>
    %85 = vector.multi_reduction <maximumf>, %84, %cst_33 [1] : vector<2x4xf32> to vector<2xf32>
    %86 = vector.shape_cast %85 : vector<2xf32> to vector<2x1xf32>
    %87 = vector.broadcast %86 : vector<2x1xf32> to vector<2x4xf32>
    %88 = arith.subf %84, %87 : vector<2x4xf32>
    %89 = math.exp %88 : vector<2x4xf32>
    %cst_34 = arith.constant dense<0.000000e+00> : vector<2xf32>
    %90 = vector.multi_reduction <add>, %89, %cst_34 [1] : vector<2x4xf32> to vector<2xf32>
    %91 = vector.shape_cast %90 : vector<2xf32> to vector<2x1xf32>
    %92 = vector.broadcast %91 : vector<2x1xf32> to vector<2x4xf32>
    %93 = arith.divf %89, %92 : vector<2x4xf32>
    %cst_35 = arith.constant 1.000000e+00 : f32
    %94 = vector.broadcast %cst_35 : f32 to vector<2x4xf32>
    %95 = arith.mulf %73, %94 : vector<2x4xf32>
    %cst_36 = arith.constant dense<0xFF800000> : vector<2xf32>
    %96 = vector.multi_reduction <maximumf>, %95, %cst_36 [1] : vector<2x4xf32> to vector<2xf32>
    %97 = vector.shape_cast %96 : vector<2xf32> to vector<2x1xf32>
    %98 = vector.broadcast %97 : vector<2x1xf32> to vector<2x4xf32>
    %99 = arith.subf %95, %98 : vector<2x4xf32>
    %100 = math.exp %99 : vector<2x4xf32>
    %cst_37 = arith.constant dense<0.000000e+00> : vector<2xf32>
    %101 = vector.multi_reduction <add>, %100, %cst_37 [1] : vector<2x4xf32> to vector<2xf32>
    %102 = vector.shape_cast %101 : vector<2xf32> to vector<2x1xf32>
    %103 = vector.broadcast %102 : vector<2x1xf32> to vector<2x4xf32>
    %104 = arith.divf %100, %103 : vector<2x4xf32>
    %cst_38 = arith.constant dense<0xFF800000> : vector<2xf32>
    %105 = vector.multi_reduction <maximumf>, %93, %cst_38 [1] : vector<2x4xf32> to vector<2xf32>
    %106 = vector.shape_cast %105 : vector<2xf32> to vector<2x1xf32>
    %107 = vector.broadcast %106 : vector<2x1xf32> to vector<2x4xf32>
    %108 = arith.subf %93, %107 : vector<2x4xf32>
    %109 = math.exp %108 : vector<2x4xf32>
    %cst_39 = arith.constant dense<0.000000e+00> : vector<2xf32>
    %110 = vector.multi_reduction <add>, %109, %cst_39 [1] : vector<2x4xf32> to vector<2xf32>
    %111 = vector.shape_cast %110 : vector<2xf32> to vector<2x1xf32>
    %112 = math.log %111 : vector<2x1xf32>
    %113 = arith.addf %106, %112 : vector<2x1xf32>
    %114 = vector.broadcast %113 : vector<2x1xf32> to vector<2x4xf32>
    %115 = arith.subf %93, %114 : vector<2x4xf32>
    %116 = vector.extract_strided_slice %0 {offsets = [0, 2], sizes = [2, 1], strides = [1, 1]} : vector<16x3xi32> to vector<2x1xi32>
    %117 = tpu.iota {dimensions = array<i32: 1>} : vector<2x4xi32>
    %118 = vector.broadcast %116 : vector<2x1xi32> to vector<2x4xi32>
    %119 = arith.cmpi eq, %117, %118 : vector<2x4xi32>
    %120 = arith.extui %119 : vector<2x4xi1> to vector<2x4xi32>
    %121 = arith.sitofp %120 : vector<2x4xi32> to vector<2x4xf32>
    %122 = arith.mulf %121, %115 : vector<2x4xf32>
    %123 = vector.shape_cast %122 : vector<2x4xf32> to vector<1x2x4xf32>
    %cst_40 = arith.constant dense<0.000000e+00> : vector<1xf32>
    %124 = vector.multi_reduction <add>, %123, %cst_40 [1, 2] : vector<1x2x4xf32> to vector<1xf32>
    %125 = vector.shape_cast %124 : vector<1xf32> to vector<1x1x1xf32>
    %126 = vector.extract %125[0, 0, 0] : f32 from vector<1x1x1xf32>
    %cst_41 = arith.constant 0.000000e+00 : f32
    %127 = arith.subf %cst_41, %126 : f32
    %cst_42 = arith.constant 2.000000e+00 : f32
    %128 = arith.divf %127, %cst_42 : f32
    %129 = arith.mulf %104, %115 : vector<2x4xf32>
    %130 = vector.shape_cast %129 : vector<2x4xf32> to vector<1x2x4xf32>
    %cst_43 = arith.constant dense<0.000000e+00> : vector<1xf32>
    %131 = vector.multi_reduction <add>, %130, %cst_43 [1, 2] : vector<1x2x4xf32> to vector<1xf32>
    %132 = vector.shape_cast %131 : vector<1xf32> to vector<1x1x1xf32>
    %133 = vector.extract %132[0, 0, 0] : f32 from vector<1x1x1xf32>
    %cst_44 = arith.constant 0.000000e+00 : f32
    %134 = arith.subf %cst_44, %133 : f32
    %cst_45 = arith.constant 2.000000e+00 : f32
    %135 = arith.divf %134, %cst_45 : f32
    %136 = arith.mulf %104, %93 : vector<2x4xf32>
    %cst_46 = arith.constant dense<0.000000e+00> : vector<2xf32>
    %137 = vector.multi_reduction <add>, %136, %cst_46 [1] : vector<2x4xf32> to vector<2xf32>
    %138 = vector.shape_cast %137 : vector<2xf32> to vector<2x1xf32>
    %139 = arith.mulf %104, %104 : vector<2x4xf32>
    %cst_47 = arith.constant dense<0.000000e+00> : vector<2xf32>
    %140 = vector.multi_reduction <add>, %139, %cst_47 [1] : vector<2x4xf32> to vector<2xf32>
    %141 = vector.shape_cast %140 : vector<2xf32> to vector<2x1xf32>
    %142 = arith.mulf %93, %93 : vector<2x4xf32>
    %cst_48 = arith.constant dense<0.000000e+00> : vector<2xf32>
    %143 = vector.multi_reduction <add>, %142, %cst_48 [1] : vector<2x4xf32> to vector<2xf32>
    %144 = vector.shape_cast %143 : vector<2xf32> to vector<2x1xf32>
    %145 = arith.mulf %141, %144 : vector<2x1xf32>
    %146 = math.sqrt %145 : vector<2x1xf32>
    %cst_49 = arith.constant 9.99999993E-9 : f32
    %147 = vector.broadcast %cst_49 : f32 to vector<2x1xf32>
    %148 = arith.maximumf %146, %147 : vector<2x1xf32>
    %149 = arith.divf %138, %148 : vector<2x1xf32>
    %cst_50 = arith.constant 1.000000e+00 : f32
    %150 = vector.broadcast %cst_50 : f32 to vector<2x1xf32>
    %151 = arith.subf %150, %149 : vector<2x1xf32>
    %152 = vector.shape_cast %151 : vector<2x1xf32> to vector<1x2x1xf32>
    %cst_51 = arith.constant dense<0.000000e+00> : vector<1xf32>
    %153 = vector.multi_reduction <add>, %152, %cst_51 [1, 2] : vector<1x2x1xf32> to vector<1xf32>
    %154 = vector.shape_cast %153 : vector<1xf32> to vector<1x1x1xf32>
    %155 = vector.extract %154[0, 0, 0] : f32 from vector<1x1x1xf32>
    %cst_52 = arith.constant 2.000000e+00 : f32
    %156 = arith.divf %155, %cst_52 : f32
    %157 = arith.addf %128, %135 : f32
    %158 = arith.addf %157, %156 : f32
    %cst_53 = arith.constant 3.000000e+00 : f32
    %159 = arith.divf %158, %cst_53 : f32
    %c0_54 = arith.constant 0 : index
    %c0_55 = arith.constant 0 : index
    %160 = vector.load %arg3[%c0_54, %c0_55] : memref<2x5xf32, #tpu.memory_space<vmem>>, vector<2x4xf32>
    tpu.vector_store %arg3[%c0_54, %c0_55], %82 {strides = array<i32>} : memref<2x5xf32, #tpu.memory_space<vmem>>, vector<2x4xf32>,
    %161 = vector.broadcast %159 : f32 to vector<1x1xf32>
    %162 = vector.shape_cast %161 : vector<1x1xf32> to vector<1x1xf32>
    %163 = vector.broadcast %162 : vector<1x1xf32> to vector<2x1xf32>
    %c0_56 = arith.constant 0 : index
    %c4_57 = arith.constant 4 : index
    %164 = vector.load %arg3[%c0_56, %c4_57] : memref<2x5xf32, #tpu.memory_space<vmem>>, vector<2x1xf32>
    tpu.vector_store %arg3[%c0_56, %c4_57], %163 {strides = array<i32>} : memref<2x5xf32, #tpu.memory_space<vmem>>, vector<2x1xf32>,
    return
  }
}

</mosaic_0001>

<bundles_post_ra>
// kernel: distillator_forward.1
= control target key start
LH: loop header
LB: loop body
LE: loop exit
PB: predicated region body
PF: predicated region fallthrough
CT: control target
= control target key end

     0   :  { %8 = vsyncpa [#allocation3], 0  ;;  %s1403_s12 = smov [#allocation2]   ;;  %s1541_s0 = inlined_call_operand.vmem [shape: s32[16,3], index: 0, kind: input, shape index: {}]   ;;  %s1542_s1 = inlined_call_operand.hbm [shape: f32[32,196], index: 1, kind: input, shape index: {}]   ;;  %s1543_s2 = inlined_call_operand.vmem [shape: f32[6,32], index: 2, kind: input, shape index: {}]   ;;  %s1544_s3 = inlined_call_operand.vmem [shape: f32[2,5], index: 3, kind: output, shape index: {}]  }
   0x1   :  { %s16_s13 = sshll.u32 %s1403_s12, 4  ;;  %s1379_s16 = scalar_lea.hbm %s1542_s1, 1024  ;;  %s17_s13 = int_to_ptr.vmem [resolvable:$true] %s16_s13 }
   0x2   :  { %p1380_p0 = scmp.ne.s32.totalorder %s1542_s1, %s1379_s16  ;;  %p1383_p1 = scmp.lt.u32.totalorder %s1379_s16, %s1542_s1 }
   0x4   :  { %p1385_p2 = pnand %p1383_p1, %p1380_p0 }
   0x6   :  { %1388 = shalt.err (!%p1385_p2)
}
   0x7   :  { %s1389_s21 = scalar_lea.vmem %s17_s13, 1024  ;;  %p1394_p4 = scmp.lt.s32.totalorder %s17_s13, %s17_s13 }
   0x8   :  { %p1390_p3 = scmp.ne.s32.totalorder %s17_s13, %s1389_s21  ;;  %p1395_p5 = scmp.lt.s32.totalorder %s1389_s21, %s1389_s21 }
   0xa   :  { %p1396_p6 = por %p1395_p5, %p1394_p4 }
   0xc   :  { %p1397_p7 = pnand %p1396_p6, %p1390_p3 }
   0xe   :  { %1400 = shalt.err (!%p1397_p7)
}
   0xf   :  { %s1404_s22 = smov 256   ;;  %s1405_s23 = smov 16  }
  0x10   :  { %22 = dma.hbm_to_vmem [thread:$0]  %s1542_s1, 1024, %s17_s13, [#allocation3], %s1404_s22, %s1404_s22, %s1405_s23  }
  0x11   :  { %1401 = dma.done.wait [#allocation3], 1024  }
  0x12   :  { %1402 = vsyncadd [#allocation3], 4294966272  ;;  %v1406_v0 = vmov 0   ;;  %v1450_v1 = vld [vmem:[%s1541_s0] sm:$0xff]  ;;  %v33_v3 = vld [vmem:[#allocation2 + $0x10] sm:$0xff]  ;;  %v1407_v11 = vmov 1   ;;  %v36_v14 = vlaneseq }
  0x13   :  { %1286 = vset.pattern.permute.xlu0 %v1406_v0  ;;  %v32_v2 = vld [vmem:[#allocation2] sm:$0xff]  ;;  %v35_v5 = vld [vmem:[#allocation2 + $0x30] sm:$0xff]  ;;  %v29_v6 = vld [vmem:[%s1541_s0 + $0x8] sm:$0xff]  ;;  %1292 = vset.pattern.permute.xlu1 %v1407_v11  ;;  %s1408_s1 = smov 96   ;;  %v30_v12 = vcvt.s32.f32 %v1450_v1  ;;  %vm50_vm0 = vcmask 261120   ;;  %v1409_v21 = vmov 0.0  }
  0x14   :  { %39 = vperm.xlu0 %1286, %v1450_v1   ;;  %v34_v4 = vld [vmem:[#allocation2 + $0x20] sm:$0xff]  ;;  %v1202_v7 = vpack.c.bf16 %v33_v3, %v32_v2  ;;  %v31_v9 = vcvt.s32.f32 %v29_v6  ;;  %v1287_v10 = vpack.i.bf16 %v33_v3, %v32_v2  ;;  %v1460_v18 = vand.u32 127, %v36_v14  ;;  %s1410_s0 = smov 64   ;;  %s1411_s30 = smov 32   ;;  %v448_v2 = vld [vmem:[#allocation2 + $0x8] sm:$0xff]  ;;  %v449_v3 = vld [vmem:[#allocation2 + $0x18] sm:$0xff] }
  0x15   :  { %v1206_v8 = vpack.c.bf16 %v35_v5, %v34_v4  ;;  %v1294_v13 = vpack.i.bf16 %v35_v5, %v34_v4  ;;  %v1030_v43 = vld [vmem:[%s1543_s2] ss:$0 sm:$0xff]  ;;  %v1033_v58 = vld [vmem:[%s1543_s2 + $0x1] ss:$0 sm:$0xff]  ;;  %v1234_v4 = vpack.c.bf16 %v449_v3, %v448_v2  ;;  %v450_v5 = vld [vmem:[#allocation2 + $0x28] sm:$0xff]  ;;  %vm1413_vm3 = vmmov 0  }
  0x16   :  { %1203 = vmatprep.subr.bf16.mxu0 %v1202_v7  ;;  %1288 = vrot.lane.b32.xlu1 %v1287_v10, %s1408_s1  ;;  %vm898_vm6 = vcmask 27650   ;;  %vm886_vm7 = vcmask 25600   ;;  %vm998_vm11 = vcmask 1024   ;;  %vm1019_vm12 = vcmask 33824  }
  0x17   :  { %1205 = vmatpush3.bf16.msra.mxu0 %v1202_v7 }
  0x18   :  { %42 = vperm.xlu0 %1286, %v29_v6   ;;  %1207 = vmatprep.subr.bf16.mxu0 %v1206_v8  ;;  %v451_v6 = vld [vmem:[#allocation2 + $0x38] sm:$0xff] }
  0x19   :  { %v1238_v7 = vpack.c.bf16 %v451_v6, %v450_v5 }
  0x1a   :  { %134 = vperm.xlu1 %1292, %v30_v12  }
  0x1b   :  { %1209 = vmatpush3.bf16.msra.mxu0 %v1206_v8  ;;  %v1412_v8 = vmov 0.0|0.0  }
  0x1c   :  { %1293 = vset.pattern.permute.xlu0 %v1407_v11 }
  0x1d   :  { %139 = vperm.xlu0 %1293, %v31_v9   ;;  %v1036_v9 = vld [vmem:[%s1543_s2 + $0x2] ss:$0 sm:$0xff] }
  0x1e   :  { %1295 = vrot.lane.b32.xlu1 %v1294_v13, %s1408_s1 }
  0x21   :  { %1305 = vrot.lane.b32.xlu0 %v1294_v13, %s1410_s0 }
  0x22   :  { %1300 = vrot.lane.b32.xlu1 %v1287_v10, %s1410_s0 }
  0x25   :  { %1315 = vrot.lane.b32.xlu0 %v1294_v13, %s1411_s30 }
  0x26   :  { %1310 = vrot.lane.b32.xlu1 %v1287_v10, %s1411_s30 }
  0x88   :  { %v1289_v15 = vpop.permute.xlu1 %1288 }
  0x89   :  { %v1291_v16 = vunpack.i.h.bf16 %v1289_v15  ;;  %v1290_v17 = vunpack.i.l.bf16 %v1289_v15 }
  0x8b   :  { %v1210_v19 = vpack.c.bf16 %v1291_v16, %v1290_v17 }
  0x8d   :  { %1211 = vmatprep.subr.bf16.mxu1 %v1210_v19 }
  0x8e   :  { %1213 = vmatpush3.bf16.msra.mxu1 %v1210_v19 }
  0x93   :  { %v40_v20 = vpop.permute.xlu0 %39 }
  0x94   :  { %vm44_vm1 = vcmp.eq.s32.totalorder %v1460_v18, %v40_v20 }
  0x95   :  { %v1026_v22 = vsel %vm44_vm1, 1.0, %v1409_v21 }
  0x96   :  { %1111 = vmatprep.mubr.msk.f32.mxu0 %vm50_vm0, %v1026_v22 }
  0x97   :  { %v43_v23 = vpop.permute.xlu0 %42 }
  0x98   :  { %vm45_vm2 = vcmp.eq.s32.totalorder %v1460_v18, %v43_v23 }
  0x99   :  { %v1027_v24 = vsel %vm45_vm2, 1.0, %v1409_v21  ;;  %v135_v25 = vpop.permute.xlu1 %134 }
  0x9a   :  { %1112 = vmatmul.mubr.msk.f32.vlgmr.msra.gmra.mrb[0].mxu0 %vm50_vm0, %v1027_v24 }
  0x9c   :  { %v140_v31 = vpop.permute.xlu0 %139 }
  0x9d   :  { %v1296_v26 = vpop.permute.xlu1 %1295 }
  0x9e   :  { %v1298_v27 = vunpack.i.h.bf16 %v1296_v26  ;;  %v1297_v28 = vunpack.i.l.bf16 %v1296_v26  ;;  %v1319_v26 = vpack.i.bf16 %v449_v3, %v448_v2  ;;  %v1049_v2 = vld [vmem:[%s1543_s2 + $0x5] ss:$0 sm:$0xff] }
  0xa0   :  { %v1214_v29 = vpack.c.bf16 %v1298_v27, %v1297_v28  ;;  %v1306_v38 = vpop.permute.xlu0 %1305  ;;  %v1324_v27 = vpack.i.bf16 %v451_v6, %v450_v5  ;;  %1320 = vrot.lane.b32.xlu1 %v1319_v26, %s1408_s1  ;;  %v618_v28 = vshrl.u32 %v36_v14, 7 }
  0xa1   :  { %v1301_v35 = vpop.permute.xlu1 %1300  ;;  %v1308_v40 = vunpack.i.h.bf16 %v1306_v38  ;;  %v1307_v41 = vunpack.i.l.bf16 %v1306_v38 }
  0xa2   :  { %1215 = vmatprep.subr.bf16.mxu1 %v1214_v29  ;;  %v1303_v36 = vunpack.i.h.bf16 %v1301_v35  ;;  %v1302_v37 = vunpack.i.l.bf16 %v1301_v35  ;;  %1325 = vrot.lane.b32.xlu0 %v1324_v27, %s1408_s1  ;;  %vm619_vm4 = vcmp.lt.s32.totalorder %v618_v28, 2 }
  0xa3   :  { %1217 = vmatpush3.bf16.msra.mxu1 %v1214_v29  ;;  %v1222_v42 = vpack.c.bf16 %v1308_v40, %v1307_v41  ;;  %v1039_v29 = vld [vmem:[%s1543_s2 + $0x3] ss:$0 sm:$0xff] }
  0xa4   :  { %v1218_v39 = vpack.c.bf16 %v1303_v36, %v1302_v37  ;;  %v1316_v54 = vpop.permute.xlu0 %1315  ;;  %v620_v36 = vmul.u32 8, %v618_v28  ;;  %1330 = vrot.lane.b32.xlu1 %v1319_v26, %s1410_s0 }
  0xa5   :  { %v1311_v48 = vpop.permute.xlu1 %1310  ;;  %v1318_v55 = vunpack.i.h.bf16 %v1316_v54  ;;  %v1317_v56 = vunpack.i.l.bf16 %v1316_v54 }
  0xa6   :  { %1219 = vmatprep.subr.bf16.mxu0 %v1218_v39  ;;  %v1313_v49 = vunpack.i.h.bf16 %v1311_v48  ;;  %v1312_v50 = vunpack.i.l.bf16 %v1311_v48  ;;  %1335 = vrot.lane.b32.xlu0 %v1324_v27, %s1410_s0 }
  0xa7   :  { %1221 = vmatpush3.bf16.msra.mxu0 %v1218_v39  ;;  %v1230_v57 = vpack.c.bf16 %v1318_v55, %v1317_v56 }
  0xa8   :  { %1223 = vmatprep.subr.bf16.mxu0 %v1222_v42  ;;  %v1226_v51 = vpack.c.bf16 %v1313_v49, %v1312_v50 }
  0xaa   :  { %1227 = vmatprep.subr.bf16.mxu1 %v1226_v51 }
  0xab   :  { %1225 = vmatpush3.bf16.msra.mxu0 %v1222_v42 }
  0xac   :  { %1235 = vmatprep.subr.bf16.mxu0 %v1234_v4 }
 0x112   :  { %v1321_v38 = vpop.permute.xlu1 %1320 }
 0x113   :  { %v1323_v40 = vunpack.i.h.bf16 %v1321_v38  ;;  %v1322_v41 = vunpack.i.l.bf16 %v1321_v38 }
 0x114   :  { %v1326_v39 = vpop.permute.xlu0 %1325 }
 0x115   :  { %v1328_v14 = vunpack.i.h.bf16 %v1326_v39  ;;  %v1327_v42 = vunpack.i.l.bf16 %v1326_v39 }
 0x16d   :  { %v1113_v30 = vpop.f32.mrb[0].mxu0 }
 0x16e   :  { %v123_v32 = vpop.f32.mrb[1].mxu0  ;;  %v143_v34 = vmul.f32 %v1113_v30, %v140_v31  ;;  %v1044_v30 = vadd.s32 4294967294, %v618_v28 }
 0x16f   :  { %v142_v33 = vmul.f32 %v135_v25, %v123_v32 }
 0x170   :  { %v622_v35 = vmul.u32 8, %v1044_v30 }
 0x171   :  { %1122 = vmatprep.mubr.msk.f32.mxu1 %vm50_vm0, %v142_v33 }
 0x172   :  { %1123 = vmatmul.mubr.msk.f32.vlgmr.msra.gmra.mrb[0].mxu1 %vm50_vm0, %v143_v34  ;;  %v623_v37 = vadd.s32 16, %v622_v35  ;;  %v1414_v35 = vmov 2  }
 0x173   :  { %1229 = vmatpush3.bf16.msra.mxu1 %v1226_v51  ;;  %1339 = vset.pattern.permute.xlu1 %v1414_v35 }
 0x174   :  { %1231 = vmatprep.subr.bf16.mxu1 %v1230_v57  ;;  %1340 = vset.pattern.permute.xlu0 %v1414_v35 }
 0x177   :  { %1233 = vmatpush3.bf16.msra.mxu1 %v1230_v57 }
 0x178   :  { %1243 = vmatprep.subr.bf16.mxu1 %v1226_v51 }
 0x245   :  { %v1124_v44 = vpop.f32.mrb[0].mxu1 }
 0x246   :  { %v243_v45 = vadd.f32 %v1124_v44, %v1030_v43  ;;  %v237_v46 = vpop.f32.mrb[1].mxu1  ;;  %v1257_v44 = vpack.c.bf16 %v1323_v40, %v1322_v41 }
 0x247   :  { %v238_v47 = vadd.f32 %v1030_v43, %v237_v46  ;;  %v624_v43 = vsel %vm619_vm4, %v620_v36, %v623_v37  ;;  %v1260_v46 = vpack.c.bf16 %v1328_v14, %v1327_v42 }
 0x248   :  { %vm625_vm5 = vcmp.eq.s32.totalorder %v1460_v18, %v624_v43 }
 0x249   :  { %1341 = vtanh.f32 %v238_v47  ;;  %v1045_v49 = vsel %vm625_vm5, 1.0, %v1409_v21 }
 0x24a   :  { %1343 = vtanh.f32 %v243_v45 }
 0x253   :  { %v1342_v52 = vpop.eup %1341 }
 0x254   :  { %v1344_v53 = vpop.eup %1343  ;;  %1133 = vmatprep.mubr.msk.f32.mxu0 %vm50_vm0, %v1342_v52 }
 0x255   :  { %1134 = vmatmul.mubr.msk.f32.vlgmr.msra.gmra.mrb[2].mxu0 %vm50_vm0, %v1344_v53 }
 0x256   :  { %1237 = vmatpush3.bf16.msra.mxu0 %v1234_v4 }
 0x257   :  { %1239 = vmatprep.subr.bf16.mxu0 %v1238_v7 }
 0x25a   :  { %1241 = vmatpush3.bf16.msra.mxu0 %v1238_v7 }
 0x25b   :  { %1250 = vmatprep.subr.bf16.mxu0 %v1412_v8 }
 0x328   :  { %v1135_v59 = vpop.f32.mrb[2].mxu0 }
 0x329   :  { %v343_v60 = vadd.f32 %v1135_v59, %v1033_v58  ;;  %v337_v61 = vpop.f32.mrb[3].mxu0 }
 0x32a   :  { %v338_v62 = vadd.f32 %v1033_v58, %v337_v61 }
 0x32c   :  { %1345 = vtanh.f32 %v338_v62 }
 0x32d   :  { %1347 = vtanh.f32 %v343_v60  ;;  %v1047_v60 = vld [vmem:[%s1543_s2 + $0x4] ss:$0 sm:$0xff] }
 0x336   :  { %v1346_v63 = vpop.eup %1345 }
 0x337   :  { %v1348_v0 = vpop.eup %1347  ;;  %1144 = vmatprep.mubr.msk.f32.mxu1 %vm50_vm0, %v1346_v63 }
 0x338   :  { %1145 = vmatmul.mubr.msk.f32.vlgmr.msra.gmra.mrb[2].mxu1 %vm50_vm0, %v1348_v0 }
 0x339   :  { %1245 = vmatpush3.bf16.msra.mxu1 %v1226_v51  ;;  %1166 = vmatprep.mubr.msk.f32.mxu1 %vm50_vm0, %v1342_v52  ;;  %v1331_v52 = vpop.permute.xlu1 %1330 }
 0x33a   :  { %1247 = vmatprep.subr.bf16.mxu1 %v1230_v57  ;;  %v1333_v54 = vunpack.i.h.bf16 %v1331_v52  ;;  %v1332_v55 = vunpack.i.l.bf16 %v1331_v52 }
 0x33c   :  { %v1263_v58 = vpack.c.bf16 %v1333_v54, %v1332_v55 }
 0x33d   :  { %1249 = vmatpush3.bf16.msra.mxu1 %v1230_v57 }
 0x33e   :  { %1256 = vmatprep.subr.bf16.mxu1 %v1412_v8 }
 0x340   :  { %1167 = vmatmul.mubr.msk.f32.vlgmr.msra.gmra.mrb[4].mxu1 %vm50_vm0, %v1344_v53  ;;  %v1336_v53 = vpop.permute.xlu0 %1335 }
 0x341   :  { %1188 = vmatprep.mubr.msk.f32.mxu1 %vm1413_vm3, %v1409_v21  ;;  %1258 = vmatpush3.bf16.msra.mxu1 %v1257_v44  ;;  %v1338_v56 = vunpack.i.h.bf16 %v1336_v53  ;;  %v1337_v57 = vunpack.i.l.bf16 %v1336_v53 }
 0x342   :  { %1259 = vmatprep.subr.bf16.mxu1 %v1412_v8 }
 0x343   :  { %v1266_v59 = vpack.c.bf16 %v1338_v56, %v1337_v57 }
 0x345   :  { %1261 = vmatpush3.bf16.msra.mxu1 %v1260_v46 }
 0x40b   :  { %v1146_v10 = vpop.f32.mrb[2].mxu1 }
 0x40c   :  { %v443_v11 = vadd.f32 %v1146_v10, %v1036_v9  ;;  %v437_v12 = vpop.f32.mrb[3].mxu1 }
 0x40d   :  { %v438_v13 = vadd.f32 %v1036_v9, %v437_v12 }
 0x40f   :  { %1349 = vtanh.f32 %v438_v13 }
 0x410   :  { %1351 = vtanh.f32 %v443_v11 }
 0x413   :  { %v1168_v15 = vpop.f32.mrb[4].mxu1 }
 0x414   :  { %v612_v16 = vadd.f32 %v1168_v15, %v1036_v9  ;;  %v606_v17 = vpop.f32.mrb[5].mxu1 }
 0x415   :  { %v607_v19 = vadd.f32 %v1036_v9, %v606_v17 }
 0x416   :  { %1353 = vtanh.f32 %v612_v16 }
 0x417   :  { %1355 = vtanh.f32 %v607_v19 }
 0x419   :  { %v1350_v20 = vpop.eup %1349 }
 0x41a   :  { %v1352_v22 = vpop.eup %1351  ;;  %1155 = vmatprep.mubr.msk.f32.mxu0 %vm50_vm0, %v1350_v20 }
 0x41b   :  { %1156 = vmatmul.mubr.msk.f32.vlgmr.msra.gmra.mrb[4].mxu0 %vm50_vm0, %v1352_v22 }
 0x41c   :  { %1177 = vmatprep.mubr.msk.f32.mxu0 %vm1413_vm3, %v1409_v21 }
 0x420   :  { %v1354_v23 = vpop.eup %1353 }
 0x421   :  { %v1356_v24 = vpop.eup %1355 }
 0x422   :  { %v1251_v25 = vpack.c.bf16 %v1354_v23, %v1356_v24 }
 0x424   :  { %1252 = vmatpush3.bf16.msra.mxu0 %v1251_v25 }
 0x425   :  { %1253 = vmatprep.subr.bf16.mxu0 %v1412_v8 }
 0x4ee   :  { %v1157_v31 = vpop.f32.mrb[4].mxu0 }
 0x4ef   :  { %v535_v32 = vadd.f32 %v1157_v31, %v1039_v29  ;;  %v529_v33 = vpop.f32.mrb[5].mxu0 }
 0x4f0   :  { %v530_v34 = vadd.f32 %v1039_v29, %v529_v33 }
 0x4f1   :  { %1357 = vtanh.f32 %v535_v32 }
 0x4f2   :  { %1359 = vtanh.f32 %v530_v34 }
 0x4fb   :  { %v1358_v45 = vpop.eup %1357 }
 0x4fc   :  { %v1360_v47 = vpop.eup %1359 }
 0x4fd   :  { %v1254_v48 = vpack.c.bf16 %v1358_v45, %v1360_v47 }
 0x4ff   :  { %1255 = vmatpush3.bf16.msra.mxu0 %v1254_v48 }
 0x500   :  { %1262 = vmatprep.subr.bf16.mxu0 %v1412_v8 }
 0x502   :  { %1178 = vmatmul.mubr.msk.f32.vlgmr.msra.gmra.mrb[6].mxu0 %vm50_vm0, %v1045_v49 }
 0x503   :  { %1199 = vmatprep.mubr.msk.f32.mxu0 %vm1413_vm3, %v1409_v21  ;;  %1264 = vmatpush3.bf16.msra.mxu0 %v1263_v58 }
 0x504   :  { %1265 = vmatprep.subr.bf16.mxu0 %v1412_v8 }
 0x507   :  { %1267 = vmatpush3.bf16.msra.mxu0 %v1266_v59 }
 0x5d5   :  { %v697_v50 = vpop.f32.mrb[6].mxu0 }
 0x5d6   :  { %v1179_v51 = vpop.f32.mrb[7].mxu0  ;;  %1189 = vmatmul.mubr.msk.f32.vlgmr.msra.gmra.mrb[6].mxu1 %vm50_vm0, %v697_v50 }
 0x6a9   :  { %v792_v61 = vpop.f32.mrb[6].mxu1 }
 0x6aa   :  { %v793_v62 = vadd.f32 %v1047_v60, %v792_v61  ;;  %v1190_v63 = vpop.f32.mrb[7].mxu1 }
 0x6ac   :  { %1361 = vtanh.f32 %v793_v62 }
 0x6b6   :  { %v1362_v0 = vpop.eup %1361 }
 0x6b7   :  { %1200 = vmatmul.mubr.msk.f32.vlgmr.msra.gmra.mrb[8].mxu0 %vm50_vm0, %v1362_v0 }
 0x78a   :  { %v882_v3 = vpop.f32.mrb[8].mxu0 }
 0x78b   :  { %v883_v4 = vadd.f32 %v1049_v2, %v882_v3  ;;  %v1201_v5 = vpop.f32.mrb[9].mxu0 }
 0x78d   :  { %v899_v6 = vsel %vm898_vm6, %v883_v4, -inf  ;;  %v887_v7 = vsel %vm886_vm7, %v883_v4, -inf }
 0x78e   :  { %900 = vmax.xlane.f32.xlu0 %v899_v6  ;;  %888 = vmax.xlane.f32.xlu1 %v887_v7 }
 0x81b   :  { %v901_v8 = vpop.xlane.xlu0 %900  ;;  %v889_v9 = vpop.xlane.xlu1 %888 }
 0x81c   :  { %v902_v10 = vsub.f32 %v883_v4, %v901_v8  ;;  %v890_v11 = vsub.f32 %v883_v4, %v889_v9 }
 0x81e   :  { %v903_v12 = vmul.f32 1.442695, %v902_v10  ;;  %v891_v13 = vmul.f32 1.442695, %v890_v11 }
 0x820   :  { %1363 = vpow2.f32 %v903_v12 }
 0x821   :  { %1365 = vpow2.f32 %v891_v13 }
 0x82a   :  { %v1364_v15 = vpop.eup %1363 }
 0x82b   :  { %v1366_v16 = vpop.eup %1365  ;;  %v905_v17 = vsel %vm898_vm6, %v1364_v15, 0.0 }
 0x82c   :  { %906 = vadd.xlane.f32.xlu1 %v905_v17  ;;  %v893_v19 = vsel %vm886_vm7, %v1366_v16, 0.0 }
 0x82d   :  { %894 = vadd.xlane.f32.xlu0 %v893_v19 }
 0x8b9   :  { %v907_v20 = vpop.xlane.xlu1 %906 }
 0x8ba   :  { %v895_v22 = vpop.xlane.xlu0 %894  ;;  %1367 = vrcp.f32 %v907_v20 }
 0x8bb   :  { %1369 = vrcp.f32 %v895_v22 }
 0x8c4   :  { %v1368_v23 = vpop.eup %1367 }
 0x8c5   :  { %v1370_v24 = vpop.eup %1369  ;;  %v909_v25 = vmul.f32 %v1368_v23, %v1364_v15 }
 0x8c6   :  { %v897_v26 = vmul.f32 %v1370_v24, %v1366_v16 }
 0x8c7   :  { %v972_v29 = vmul.f32 %v909_v25, %v909_v25 }
 0x8c8   :  { %1017 = vst.msk [vmem:[%s1544_s3] sm:$0x3] %vm886_vm7, %v897_v26  ;;  %v910_v27 = vsel %vm886_vm7, %v897_v26, -inf  ;;  %v976_v28 = vmul.f32 %v897_v26, %v897_v26  ;;  %v966_v30 = vrot.slane %v897_v26, 6 }
 0x8c9   :  { %911 = vmax.xlane.f32.xlu0 %v910_v27  ;;  %v973_v32 = vsel %vm898_vm6, %v972_v29, 0.0 }
 0x8ca   :  { %v977_v31 = vsel %vm886_vm7, %v976_v28, 0.0  ;;  %v968_v33 = vmul.f32 %v966_v30, %v909_v25 }
 0x8cb   :  { %978 = vadd.xlane.f32.xlu1 %v977_v31 }
 0x8cc   :  { %v969_v34 = vsel %vm898_vm6, %v968_v33, 0.0 }
 0x8cd   :  { %974 = vadd.xlane.f32.xlu0 %v973_v32 }
 0x8d1   :  { %970 = vadd.xlane.f32.xlu0 %v969_v34 }
 0x956   :  { %v912_v36 = vpop.xlane.xlu0 %911 }
 0x957   :  { %v913_v37 = vsub.f32 %v897_v26, %v912_v36 }
 0x958   :  { %v979_v41 = vpop.xlane.xlu1 %978 }
 0x959   :  { %v914_v38 = vmul.f32 1.442695, %v913_v37  ;;  %v981_v14 = vrot.slane %v979_v41, 6 }
 0x95a   :  { %v975_v42 = vpop.xlane.xlu0 %974 }
 0x95b   :  { %1371 = vpow2.f32 %v914_v38  ;;  %v983_v43 = vmul.f32 %v981_v14, %v975_v42 }
 0x95d   :  { %1373 = vrsqrt.f32 %v983_v43  ;;  %vm986_vm8 = vcmp.eq.f32.partialorder %v983_v43, inf  ;;  %v989_v47 = vand.u32 2147483648, %v983_v43  ;;  %vm988_vm9 = vcmp.eq.f32.partialorder %v983_v43, 0.0 }
 0x95e   :  { %v971_v55 = vpop.xlane.xlu0 %970 }
 0x965   :  { %v1372_v39 = vpop.eup %1371 }
 0x966   :  { %v916_v40 = vsel %vm886_vm7, %v1372_v39, 0.0 }
 0x967   :  { %917 = vadd.xlane.f32.xlu1 %v916_v40  ;;  %v1374_v44 = vpop.eup %1373 }
 0x968   :  { %v985_v45 = vmul.f32 %v1374_v44, %v983_v43 }
 0x96a   :  { %v987_v46 = vsel %vm986_vm8, %v983_v43, %v985_v45 }
 0x96b   :  { %v990_v48 = vsel %vm988_vm9, %v989_v47, %v987_v46 }
 0x96c   :  { %v991_v49 = vmax.f32 %v990_v48, 1e-08 }
 0x978   :  { %924 = vperm.xlu1 %1339, %v1450_v1  }
 0x9f4   :  { %v918_v50 = vpop.xlane.xlu1 %917 }
 0x9f5   :  { %1375 = vlog2.f32 %v918_v50 }
 0x9f6   :  { %1377 = vrcp.f32 %v991_v49 }
 0x9f8   :  { %v925_v51 = vpop.permute.xlu1 %924 }
 0x9f9   :  { %vm926_vm10 = vcmp.eq.s32.totalorder %v1460_v18, %v925_v51 }
 0x9fa   :  { %v1051_v56 = vsel %vm926_vm10, 1.0, %v1409_v21 }
 0x9ff   :  { %v1376_v52 = vpop.eup %1375 }
 0xa00   :  { %v920_v53 = vmul.f32 0.6931472, %v1376_v52  ;;  %v1378_v1 = vpop.eup %1377 }
 0xa01   :  { %v993_v57 = vmul.f32 %v1378_v1, %v971_v55 }
 0xa02   :  { %v921_v54 = vadd.f32 %v920_v53, %v912_v36 }
 0xa03   :  { %v994_v61 = vsub.f32 1.0, %v993_v57 }
 0xa04   :  { %v922_v58 = vsub.f32 %v897_v26, %v921_v54 }
 0xa05   :  { %v996_v2 = vrot.slane %v994_v61, 2 }
 0xa06   :  { %v929_v59 = vmul.f32 %v1051_v56, %v922_v58  ;;  %v945_v60 = vrot.slane %v922_v58, 6 }
 0xa07   :  { %v999_v18 = vsel %vm998_vm11, %v996_v2, 0.0 }
 0xa08   :  { %v930_v62 = vsel %vm886_vm7, %v929_v59, 0.0  ;;  %v947_v63 = vmul.f32 %v945_v60, %v909_v25 }
 0xa09   :  { %931 = vadd.xlane.f32.xlu0 %v930_v62 }
 0xa0a   :  { %v949_v0 = vrot.slane %v947_v63, 2 }
 0xa0c   :  { %v951_v3 = vsel %vm886_vm7, %v949_v0, 0.0 }
 0xa0d   :  { %952 = vadd.xlane.f32.xlu0 %v951_v3 }
 0xa11   :  { %1000 = vadd.xlane.f32.xlu0 %v999_v18 }
 0xa96   :  { %v932_v4 = vpop.xlane.xlu0 %931 }
 0xa97   :  { %v933_v5 = vrot.slane %v932_v4, 4 }
 0xa99   :  { %v934_v21 = vadd.f32 %v933_v5, %v932_v4 }
 0xa9a   :  { %v953_v6 = vpop.xlane.xlu0 %952 }
 0xa9b   :  { %v935_v7 = vrot.slane %v934_v21, 2  ;;  %v954_v8 = vrot.slane %v953_v6, 4 }
 0xa9d   :  { %v955_v9 = vadd.f32 %v954_v8, %v953_v6  ;;  %v936_v10 = vadd.f32 %v935_v7, %v934_v21 }
 0xa9e   :  { %v1001_v11 = vpop.xlane.xlu0 %1000 }
 0xa9f   :  { %v956_v12 = vrot.slane %v955_v9, 2  ;;  %v1002_v13 = vrot.slane %v1001_v11, 4  ;;  %v937_v15 = vrot.slane %v936_v10, 1 }
 0xaa1   :  { %v1003_v16 = vadd.f32 %v1002_v13, %v1001_v11  ;;  %v938_v17 = vadd.f32 %v937_v15, %v936_v10  ;;  %v957_v19 = vadd.f32 %v956_v12, %v955_v9 }
 0xaa3   :  { %v1004_v20 = vrot.slane %v1003_v16, 2  ;;  %1268 = vpush %v938_v17  ;;  %v958_v22 = vrot.slane %v957_v19, 1 }
 0xaa5   :  { %v1005_v23 = vadd.f32 %v1004_v20, %v1003_v16  ;;  %v959_v24 = vadd.f32 %v958_v22, %v957_v19 }
 0xaa7   :  { %1270 = vpush %v959_v24  ;;  %v1006_v25 = vrot.slane %v1005_v23, 1 }
 0xaa9   :  { %v1007_v26 = vadd.f32 %v1006_v25, %v1005_v23 }
 0xaab   :  { %1272 = vpush %v1007_v26 }
 0xad4   :  { %s1269_s17 = spop %1268 }
 0xad5   :  { %s940_s18 = ssub.f32 0.0, %s1269_s17 }
 0xad7   :  { %s943_s21 = smul.f32 0.5, %s940_s18 }
 0xad8   :  { %s1271_s19 = spop %1270 }
 0xad9   :  { %s961_s20 = ssub.f32 0.0, %s1271_s19 }
 0xadb   :  { %s964_s22 = smul.f32 0.5, %s961_s20 }
 0xadc   :  { %s1273_s23 = spop %1272 }
 0xadd   :  { %s1012_s24 = sadd.f32 %s964_s22, %s943_s21  ;;  %s1011_s25 = smul.f32 0.5, %s1273_s23 }
 0xadf   :  { %s1013_s26 = sadd.f32 %s1012_s24, %s1011_s25 }
 0xae1   :  { %s1016_s27 = smul.f32 0.33333334, %s1013_s26 }
 0xae3   :  { %v1018_v27 = vstv %s1016_s27 }
 0xae4   :  { %1020 = vst.msk [vmem:[%s1544_s3] sm:$0x3] %vm1019_vm12, %v1018_v27 }
 0xae5   :  { %1025 = vsyncpa [#allocation3], 1 }

</bundles_post_ra>
